<compile_context>
chip_gen: v7x
topology: tpu7x:2x2x1
jax: 0.10.0
libtpu: 0.0.40
codegen_flags: <defaults>
</compile_context>

<pallas_src>
import functools

import jax
import jax.numpy as jnp
from jax.experimental import pallas as pl
from jax.experimental.pallas import tpu as pltpu


def _round_up(x, m):
    return (x + m - 1) // m * m


def _vmem_limit_bytes():
    """Scoped-VMEM budget: ~7/8 of physical (v5e/v6e 128 MiB, v7x 64 MiB)."""
    try:
        cap = int(pltpu.get_tpu_info().vmem_capacity_bytes)
    except Exception:  # conservative fallback, safe on every current chip
        cap = 64 * 1024 * 1024
    return (cap // 8) * 7


# ----------------------------------------------------------------------------
# helpers (run inside kernels)
# ----------------------------------------------------------------------------
def _layernorm_masked(x, w, b, d_valid, eps=1e-5):
    """LayerNorm over the last dim (works for (..., D_pad) f32).

    Columns >= d_valid are zero padding, so sums over the padded width equal
    sums over the real columns; statistics are divided by d_valid.  Padded
    columns stay exactly zero because w/b are zero there.
    """
    inv_d = 1.0 / d_valid
    mu = jnp.sum(x, axis=-1, keepdims=True) * inv_d
    var = jnp.maximum(jnp.sum(x * x, axis=-1, keepdims=True) * inv_d - mu * mu, 0.0)
    return (x - mu) * jax.lax.rsqrt(var + eps) * w + b


# ----------------------------------------------------------------------------
# patch embedding kernel: unfolded patches @ W + b  (the Conv2d hot path)
# ----------------------------------------------------------------------------
def _patch_embed_kernel(p_ref, w_ref, b_ref, o_ref):
    o_ref[...] = (
        jnp.dot(p_ref[...], w_ref[...], preferred_element_type=jnp.float32)
        + b_ref[...]
    ).astype(o_ref.dtype)


def patch_embed(x_nchw, w_bf16, b_f32, patch_size):
    B, C, H, W = x_nchw.shape
    P = patch_size
    nh, nw = H // P, W // P
    # unfold: (B, C, H, W) -> (B*N, C*P*P); patch vector ordered (C, ph, pw)
    # to match PyTorch Conv2d weight (out, in, kh, kw) flattening.
    patches = x_nchw.reshape(B, C, nh, P, nw, P).transpose(0, 2, 4, 1, 3, 5)
    patches = patches.reshape(B * nh * nw, C * P * P)
    M, K = patches.shape
    D_pad = w_bf16.shape[1]

    tm = min(256, _round_up(M, 16))          # sublane-aligned row tile
    Mp = _round_up(M, tm)
    patches = jnp.pad(patches, ((0, Mp - M), (0, 0))).astype(jnp.bfloat16)

    out = pl.pallas_call(
        _patch_embed_kernel,
        out_shape=jax.ShapeDtypeStruct((Mp, D_pad), jnp.float32),
        grid=(Mp // tm,),
        in_specs=[
            pl.BlockSpec((tm, K), lambda i: (i, 0)),
            pl.BlockSpec((K, D_pad), lambda i: (0, 0)),
            pl.BlockSpec((1, D_pad), lambda i: (0, 0)),
        ],
        out_specs=pl.BlockSpec((tm, D_pad), lambda i: (i, 0)),
        compiler_params=pltpu.CompilerParams(dimension_semantics=("parallel",)),
    )(patches, w_bf16, b_f32)
    return out[:M].reshape(B, nh * nw, D_pad)


# ----------------------------------------------------------------------------
# fused encoder kernel: grid = (batch_chunk, layer); the batch chunk of
# activations stays resident in a VMEM f32 scratch across the layer axis while
# the BlockSpec pipeline prefetches layer l+1's bf16 weight set.
# ----------------------------------------------------------------------------
def _encoder_kernel(x_ref, ln1w, ln1b, wqkv, wo, bo, ln2w, ln2b,
                    w1, b1, w2, b2, lnfw, lnfb, o_ref, acc_ref,
                    *, num_heads, d_real, t_real):
    l = pl.program_id(1)

    @pl.when(l == 0)
    def _():
        acc_ref[...] = x_ref[...].astype(jnp.float32)

    x = acc_ref[...]                               # (Bc, T_pad, D_pad) f32
    bc, t_pad, d_pad = x.shape
    hd_pad = d_pad // num_heads
    m = bc * t_pad

    # ---------------- attention (pre-norm) ----------------
    xn = _layernorm_masked(x, ln1w[0], ln1b[0], d_real)
    xn_bf = xn.reshape(m, d_pad).astype(jnp.bfloat16)
    # fused QKV projection: one full-width MXU matmul; the 1/sqrt(hd) softmax
    # scale is already folded into the q columns of wqkv.
    qkv = jnp.dot(xn_bf, wqkv[0], preferred_element_type=jnp.float32)
    qkv = qkv.reshape(bc, t_pad, 3 * d_pad).astype(jnp.bfloat16)

    # tiny additive key-padding mask, broadcast over (Bc, T, T) in the add
    key_idx = jax.lax.broadcasted_iota(jnp.int32, (1, 1, t_pad), 2)
    kmask = jnp.where(key_idx < t_real, 0.0, -1e30).astype(jnp.float32)

    heads = []
    for h in range(num_heads):                     # unrolled at trace time
        q_h = qkv[:, :, h * hd_pad:(h + 1) * hd_pad]
        k_h = qkv[:, :, d_pad + h * hd_pad:d_pad + (h + 1) * hd_pad]
        v_h = qkv[:, :, 2 * d_pad + h * hd_pad:2 * d_pad + (h + 1) * hd_pad]
        s = jnp.einsum("btd,bsd->bts", q_h, k_h,
                       preferred_element_type=jnp.float32)
        s = s + kmask                              # mask padded key tokens
        s = s - jnp.max(s, axis=-1, keepdims=True)
        p = jnp.exp(s)
        p = p * pl.reciprocal(jnp.sum(p, axis=-1, keepdims=True), approx=True)
        heads.append(jnp.einsum("bts,bsd->btd", p.astype(jnp.bfloat16), v_h,
                                preferred_element_type=jnp.float32))
    ah = jnp.concatenate(heads, axis=-1)           # (Bc, T_pad, D_pad) f32
    # fused output projection: concat(heads) @ Wo as one full-K matmul
    proj = jnp.dot(ah.reshape(m, d_pad).astype(jnp.bfloat16), wo[0],
                   preferred_element_type=jnp.float32)
    x = x + proj.reshape(bc, t_pad, d_pad) + bo[0]     # residual 1

    # ---------------- MLP (pre-norm) ----------------
    xn2 = _layernorm_masked(x, ln2w[0], ln2b[0], d_real)
    h1 = jnp.dot(xn2.reshape(m, d_pad).astype(jnp.bfloat16), w1[0],
                 preferred_element_type=jnp.float32) + b1[0]
    # TODO(synk): nn.GELU() default is exact erf-GELU; tanh approximation used
    # here for guaranteed Mosaic lowering (difference ~1e-3).
    h1 = jax.nn.gelu(h1, approximate=True)
    mlp = jnp.dot(h1.astype(jnp.bfloat16), w2[0],
                  preferred_element_type=jnp.float32) + b2[0]
    x = x + mlp.reshape(bc, t_pad, d_pad)              # residual 2

    acc_ref[...] = x

    @pl.when(l == pl.num_programs(1) - 1)
    def _():
        cls = x[:, 0:1, :]                             # (Bc, 1, D_pad) CLS token
        o_ref[...] = _layernorm_masked(cls, lnfw[...], lnfb[...],
                                       d_real).astype(o_ref.dtype)


def encoder_forward(x_pad, kp, *, num_heads, d_real, t_real, batch_chunk=None):
    B, T_pad, D_pad = x_pad.shape
    L = kp["wqkv"].shape[0]

    bc = batch_chunk if batch_chunk is not None else min(B, 8)
    bc = max(1, min(bc, B))
    B_pad = _round_up(B, bc)
    if B_pad != B:
        x_pad = jnp.pad(x_pad, ((0, B_pad - B), (0, 0), (0, 0)))
    n_chunks = B_pad // bc

    stacked_names = ("ln1w", "ln1b", "wqkv", "wo", "bo",
                     "ln2w", "ln2b", "w1", "b1", "w2", "b2")
    stacked = [kp[n] for n in stacked_names]

    def _stacked_spec(arr):
        nz = arr.ndim - 1
        return pl.BlockSpec((1,) + tuple(arr.shape[1:]),
                            lambda c, l, _nz=nz: (l,) + (0,) * _nz)

    in_specs = [pl.BlockSpec((bc, T_pad, D_pad), lambda c, l: (c, 0, 0))]
    in_specs += [_stacked_spec(a) for a in stacked]
    in_specs += [pl.BlockSpec(kp["lnf_w"].shape, lambda c, l: (0, 0)),
                 pl.BlockSpec(kp["lnf_b"].shape, lambda c, l: (0, 0))]

    # TODO(synk): for ViT-B-scale weights on v7x (64 MiB physical VMEM), also
    # K-tile w1/w2 over the 4*D hidden axis with an extra "arbitrary" grid
    # axis; unnecessary at these shapes.
    out = pl.pallas_call(
        functools.partial(_encoder_kernel, num_heads=num_heads,
                          d_real=d_real, t_real=t_real),
        out_shape=jax.ShapeDtypeStruct((B_pad, 1, D_pad), jnp.float32),
        grid=(n_chunks, L),
        in_specs=in_specs,
        out_specs=pl.BlockSpec((bc, 1, D_pad), lambda c, l: (c, 0, 0)),
        scratch_shapes=[pltpu.VMEM((bc, T_pad, D_pad), jnp.float32)],
        compiler_params=pltpu.CompilerParams(
            dimension_semantics=("parallel", "arbitrary"),
            vmem_limit_bytes=_vmem_limit_bytes()),
    )(x_pad, *stacked, kp["lnf_w"], kp["lnf_b"])
    return out[:B].reshape(B, D_pad)[:, :d_real]


# ----------------------------------------------------------------------------
# parameter padding / packing for the kernels (bf16 weights, lane-dense dims)
# ----------------------------------------------------------------------------
def _prepare_kernel_params(params, num_heads):
    d_real = int(params["ln_w"].shape[0])
    D_pad = _round_up(d_real, 128)
    assert D_pad % num_heads == 0, "padded hidden dim must split across heads"
    hd_real = d_real // num_heads
    hd_pad = D_pad // num_heads
    Hm_pad = _round_up(4 * d_real, 128)
    scale = float(hd_real) ** -0.5          # softmax scale folded into wq

    def pad_vec(v, n):
        return jnp.pad(v, (0, n - v.shape[0])).reshape(1, n).astype(jnp.float32)

    def pad_mat(w, r, c):
        return jnp.pad(w, ((0, r - w.shape[0]), (0, c - w.shape[1])))

    def head_in(w):    # (D, H*hd) -> (D_pad, H*hd_pad), head-major columns
        w = w.reshape(d_real, num_heads, hd_real)
        w = jnp.pad(w, ((0, D_pad - d_real), (0, 0), (0, hd_pad - hd_real)))
        return w.reshape(D_pad, num_heads * hd_pad)

    def head_out(w):   # (H*hd, D) -> (H*hd_pad, D_pad), head-major rows
        w = w.reshape(num_heads, hd_real, d_real)
        w = jnp.pad(w, ((0, 0), (0, hd_pad - hd_real), (0, D_pad - d_real)))
        return w.reshape(num_heads * hd_pad, D_pad)

    names = ("ln1w", "ln1b", "wqkv", "wo", "bo",
             "ln2w", "ln2b", "w1", "b1", "w2", "b2")
    acc = {n: [] for n in names}
    for blk in params["blocks"]:
        acc["ln1w"].append(pad_vec(blk["ln1_w"], D_pad))
        acc["ln1b"].append(pad_vec(blk["ln1_b"], D_pad))
        acc["wqkv"].append(jnp.concatenate(
            [head_in(blk["wq"] * scale), head_in(blk["wk"]), head_in(blk["wv"])],
            axis=1))                                     # (D_pad, 3*D_pad)
        acc["wo"].append(head_out(blk["wo"]))            # (D_pad, D_pad)
        acc["bo"].append(pad_vec(blk["bo"], D_pad))
        acc["ln2w"].append(pad_vec(blk["ln2_w"], D_pad))
        acc["ln2b"].append(pad_vec(blk["ln2_b"], D_pad))
        acc["w1"].append(pad_mat(blk["w1"], D_pad, Hm_pad))
        acc["b1"].append(pad_vec(blk["b1"], Hm_pad))
        acc["w2"].append(pad_mat(blk["w2"], Hm_pad, D_pad))
        acc["b2"].append(pad_vec(blk["b2"], D_pad))

    bf16_names = {"wqkv", "wo", "w1", "w2"}
    kp = {n: jnp.stack(v).astype(jnp.bfloat16 if n in bf16_names else jnp.float32)
          for n, v in acc.items()}
    kp.update({
        "patch_w": pad_mat(params["patch_w"], params["patch_w"].shape[0],
                           D_pad).astype(jnp.bfloat16),
        "patch_b": pad_vec(params["patch_b"], D_pad),
        "cls_token": jnp.pad(params["cls_token"],
                             ((0, 0), (0, 0), (0, D_pad - d_real))),
        "pos_embedding": jnp.pad(params["pos_embedding"],
                                 ((0, 0), (0, 0), (0, D_pad - d_real))),
        "lnf_w": pad_vec(params["ln_w"], D_pad),
        "lnf_b": pad_vec(params["ln_b"], D_pad),
        "d_pad": D_pad, "d_real": d_real,
    })
    return kp


# ----------------------------------------------------------------------------
# full ViT forward
# ----------------------------------------------------------------------------
def vit_forward(x_nchw, params, *, patch_size, num_heads, batch_chunk=None):
    kp = _prepare_kernel_params(params, num_heads)
    B = x_nchw.shape[0]
    D_pad, d_real = kp["d_pad"], kp["d_real"]

    tok = patch_embed(x_nchw, kp["patch_w"], kp["patch_b"], patch_size)  # (B,N,Dp)
    cls = jnp.broadcast_to(kp["cls_token"], (B, 1, D_pad))
    x = jnp.concatenate([cls, tok], axis=1) + kp["pos_embedding"]        # (B,T,Dp)
    # embedding dropout = identity (eval mode)
    T = x.shape[1]
    T_pad = _round_up(T, 16)                  # bf16 sublane packing (16 rows/vreg)
    x = jnp.pad(x, ((0, 0), (0, T_pad - T), (0, 0)))
    return encoder_forward(x, kp, num_heads=num_heads, d_real=d_real,
                           t_real=T, batch_chunk=batch_chunk)


# ----------------------------------------------------------------------------
# pure-JAX reference (same semantics, f32) for a correctness spot-check
# ----------------------------------------------------------------------------
def vit_reference(x, params, *, patch_size, num_heads):
    B, C, H, W = x.shape
    P = patch_size
    nh, nw = H // P, W // P
    patches = x.reshape(B, C, nh, P, nw, P).transpose(0, 2, 4, 1, 3, 5)
    patches = patches.reshape(B, nh * nw, C * P * P)
    tok = patches @ params["patch_w"] + params["patch_b"]
    cls = jnp.broadcast_to(params["cls_token"], (B, 1, tok.shape[-1]))
    y = jnp.concatenate([cls, tok], axis=1) + params["pos_embedding"]
    d = y.shape[-1]
    hd = d // num_heads

    def ln(v, w, b, eps=1e-5):
        mu = v.mean(-1, keepdims=True)
        var = v.var(-1, keepdims=True)
        return (v - mu) / jnp.sqrt(var + eps) * w + b

    for blk in params["blocks"]:
        xn = ln(y, blk["ln1_w"], blk["ln1_b"])
        q = (xn @ blk["wq"]).reshape(B, -1, num_heads, hd).transpose(0, 2, 1, 3)
        k = (xn @ blk["wk"]).reshape(B, -1, num_heads, hd).transpose(0, 2, 1, 3)
        v = (xn @ blk["wv"]).reshape(B, -1, num_heads, hd).transpose(0, 2, 1, 3)
        s = jnp.einsum("bhtd,bhsd->bhts", q, k) / jnp.sqrt(float(hd))
        p = jax.nn.softmax(s, axis=-1)
        a = jnp.einsum("bhts,bhsd->bhtd", p, v).transpose(0, 2, 1, 3)
        a = a.reshape(B, -1, d)
        y = y + a @ blk["wo"] + blk["bo"]
        xn2 = ln(y, blk["ln2_w"], blk["ln2_b"])
        h1 = jax.nn.gelu(xn2 @ blk["w1"] + blk["b1"], approximate=True)
        y = y + h1 @ blk["w2"] + blk["b2"]
    return ln(y[:, 0], params["ln_w"], params["ln_b"])


# ----------------------------------------------------------------------------
# deterministic parameter init (synthetic, matches module shapes)
# ----------------------------------------------------------------------------
def init_block_params(key, d):
    ks = jax.random.split(key, 6)
    s = 0.02
    return {
        "ln1_w": jnp.ones((d,), jnp.float32), "ln1_b": jnp.zeros((d,), jnp.float32),
        "wq": jax.random.normal(ks[0], (d, d), jnp.float32) * s,   # heads concat on cols
        "wk": jax.random.normal(ks[1], (d, d), jnp.float32) * s,
        "wv": jax.random.normal(ks[2], (d, d), jnp.float32) * s,
        "wo": jax.random.normal(ks[3], (d, d), jnp.float32) * s,   # heads concat on rows
        "bo": jnp.zeros((d,), jnp.float32),
        "ln2_w": jnp.ones((d,), jnp.float32), "ln2_b": jnp.zeros((d,), jnp.float32),
        "w1": jax.random.normal(ks[4], (d, 4 * d), jnp.float32) * s,
        "b1": jnp.zeros((4 * d,), jnp.float32),
        "w2": jax.random.normal(ks[5], (4 * d, d), jnp.float32) * s,
        "b2": jnp.zeros((d,), jnp.float32),
    }


def init_params(key, *, image_size, patch_size, in_channels, num_hidden, num_blocks):
    d = num_hidden
    n = (image_size // patch_size) ** 2
    k = in_channels * patch_size * patch_size
    keys = jax.random.split(key, 2 + num_blocks)
    return {
        "patch_w": jax.random.normal(keys[0], (k, d), jnp.float32) * 0.02,
        "patch_b": jnp.zeros((d,), jnp.float32),
        "cls_token": jnp.zeros((1, 1, d), jnp.float32),
        "pos_embedding": jax.random.normal(keys[1], (1, n + 1, d), jnp.float32),
        "blocks": [init_block_params(keys[2 + i], d) for i in range(num_blocks)],
        "ln_w": jnp.ones((d,), jnp.float32),
        "ln_b": jnp.zeros((d,), jnp.float32),
    }


if __name__ == "__main__":
    image_size, patch_size, in_channels = 16, 4, 3
    num_hidden, num_heads, num_blocks = 32, 4, 2
    batch = 2

    key = jax.random.PRNGKey(0)
    pkey, xkey = jax.random.split(key)
    params = init_params(
        pkey,
        image_size=image_size,
        patch_size=patch_size,
        in_channels=in_channels,
        num_hidden=num_hidden,
        num_blocks=num_blocks,
    )
    x = jax.random.normal(xkey, (batch, in_channels, image_size, image_size),
                          jnp.float32)

    out = vit_forward(x, params, patch_size=patch_size, num_heads=num_heads)
    out = jax.block_until_ready(out)
    assert out.shape == (batch, num_hidden), out.shape
    assert bool(jnp.all(jnp.isfinite(out)))

    ref = vit_reference(x, params, patch_size=patch_size, num_heads=num_heads)
    max_err = float(jnp.max(jnp.abs(out - ref)))
    assert max_err < 3e-2, f"max abs err vs reference: {max_err}"

    print("KERNEL_OK")
</pallas_src>

<mosaic_0001>
module attributes {stable_mosaic.version = 11 : i64} {
  func.func @_patch_embed_kernel(%arg0: i32, %arg1: memref<32x48xbf16, #tpu.memory_space<vmem>>, %arg2: memref<48x128xbf16, #tpu.memory_space<vmem>>, %arg3: memref<1x128xf32, #tpu.memory_space<vmem>>, %arg4: memref<32x128xf32, #tpu.memory_space<vmem>>) attributes {dimension_semantics = [#tpu.dimension_semantics<parallel>], iteration_bounds = array<i64: 1>, scalar_prefetch = 0 : i64, scratch_operands = 0 : i64, tpu.core_type = #tpu.core_type<tc>, window_params = [{transform_indices = @transform_0, window_bounds = array<i64: 32, 48>}, {pipeline_mode = #tpu.pipeline_mode<synchronous>, transform_indices = @transform_1, window_bounds = array<i64: 48, 128>}, {pipeline_mode = #tpu.pipeline_mode<synchronous>, transform_indices = @transform_2, window_bounds = array<i64: 1, 128>}, {transform_indices = @transform_3, window_bounds = array<i64: 32, 128>}]} {
    %c0 = arith.constant 0 : index
    %c0_0 = arith.constant 0 : index
    %0 = vector.load %arg1[%c0, %c0_0] : memref<32x48xbf16, #tpu.memory_space<vmem>>, vector<32x48xbf16>
    %c0_1 = arith.constant 0 : index
    %c0_2 = arith.constant 0 : index
    %1 = vector.load %arg2[%c0_1, %c0_2] : memref<48x128xbf16, #tpu.memory_space<vmem>>, vector<48x128xbf16>
    %cst = arith.constant dense<0.000000e+00> : vector<32x128xf32>
    %2 = tpu.matmul %0, %1, %cst {dimension_numbers = #tpu.dot_dimension_numbers<[1], [0], [0], [1], [0, 0, 1, 1], [], []>} : vector<32x48xbf16>, vector<48x128xbf16>, vector<32x128xf32> -> vector<32x128xf32>
    %c0_3 = arith.constant 0 : index
    %c0_4 = arith.constant 0 : index
    %3 = vector.load %arg3[%c0_3, %c0_4] : memref<1x128xf32, #tpu.memory_space<vmem>>, vector<1x128xf32>
    %4 = vector.broadcast %3 : vector<1x128xf32> to vector<32x128xf32>
    %5 = arith.addf %2, %4 : vector<32x128xf32>
    %c0_5 = arith.constant 0 : index
    %c0_6 = arith.constant 0 : index
    %6 = vector.load %arg4[%c0_5, %c0_6] : memref<32x128xf32, #tpu.memory_space<vmem>>, vector<32x128xf32>
    tpu.vector_store %arg4[%c0_5, %c0_6], %5 {strides = array<i32>} : memref<32x128xf32, #tpu.memory_space<vmem>>, vector<32x128xf32>,
    return
  }
  func.func @transform_0(%arg0: i32) -> (i32, i32) {
    %c0_i32 = arith.constant 0 : i32
    %c0_i32_0 = arith.constant 0 : i32
    return %arg0, %c0_i32 : i32, i32
  }
  func.func @transform_1(%arg0: i32) -> (i32, i32) {
    %c0_i32 = arith.constant 0 : i32
    %c0_i32_0 = arith.constant 0 : i32
    %c0_i32_1 = arith.constant 0 : i32
    return %c0_i32, %c0_i32_0 : i32, i32
  }
  func.func @transform_2(%arg0: i32) -> (i32, i32) {
    %c0_i32 = arith.constant 0 : i32
    %c0_i32_0 = arith.constant 0 : i32
    %c0_i32_1 = arith.constant 0 : i32
    return %c0_i32, %c0_i32_0 : i32, i32
  }
  func.func @transform_3(%arg0: i32) -> (i32, i32) {
    %c0_i32 = arith.constant 0 : i32
    %c0_i32_0 = arith.constant 0 : i32
    return %arg0, %c0_i32 : i32, i32
  }
}

</mosaic_0001>

<bundles_post_ra>
// kernel: tpu_custom_call.1
= control target key start
LH: loop header
LB: loop body
LE: loop exit
PB: predicated region body
PF: predicated region fallthrough
CT: control target
= control target key end

     0   :  { %8 = vsyncpa [#allocation3], 0  ;;  %s340_s0 = inlined_call_operand.hbm [shape: bf16[32,48], index: 0, kind: input, shape index: {}]   ;;  %s341_s1 = inlined_call_operand.hbm [shape: bf16[48,128], index: 1, kind: input, shape index: {}]   ;;  %s342_s2 = inlined_call_operand.vmem [shape: f32[1,128], index: 2, kind: input, shape index: {}]   ;;  %s343_s3 = inlined_call_operand.hbm [shape: f32[32,128], index: 3, kind: output, shape index: {}]  }
   0x1   :  { %9 = vsyncpa [#allocation6], 0 }
   0x2   :  { %10 = vsyncpa [#allocation4], 0  ;;  %s274_s12 = smov [#allocation2]   ;;  %s202_s16 = scalar_lea.hbm %s340_s0, 256 }
   0x3   :  { %s16_s13 = sshll.u32 %s274_s12, 4  ;;  %p203_p0 = scmp.ne.s32.totalorder %s340_s0, %s202_s16  ;;  %s17_s13 = int_to_ptr.vmem [resolvable:$true] %s16_s13 }
   0x4   :  { %p206_p1 = scmp.lt.u32.totalorder %s202_s16, %s340_s0 }
   0x6   :  { %p208_p2 = pnand %p206_p1, %p203_p0 }
   0x8   :  { %211 = shalt.err (!%p208_p2)
}
   0x9   :  { %s212_s21 = scalar_lea.vmem %s17_s13, 256  ;;  %p217_p4 = scmp.lt.s32.totalorder %s17_s13, %s17_s13 }
   0xa   :  { %p213_p3 = scmp.ne.s32.totalorder %s17_s13, %s212_s21  ;;  %p218_p5 = scmp.lt.s32.totalorder %s212_s21, %s212_s21 }
   0xc   :  { %p219_p6 = por %p218_p5, %p217_p4 }
   0xe   :  { %p220_p7 = pnand %p219_p6, %p213_p3 }
  0x10   :  { %223 = shalt.err (!%p220_p7)
}
  0x11   :  { %s275_s22 = smov 64   ;;  %s276_s23 = smov 4  }
  0x12   :  { %22 = dma.hbm_to_vmem [thread:$0]  %s340_s0, 256, %s17_s13, [#allocation3], %s275_s22, %s275_s22, %s276_s23  }
  0x13   :  { %s277_s26 = smov [#allocation5]   ;;  %s224_s30 = scalar_lea.hbm %s341_s1, 384 }
  0x14   :  { %s28_s27 = sshll.u32 %s277_s26, 4  ;;  %p225_p8 = scmp.ne.s32.totalorder %s341_s1, %s224_s30  ;;  %s29_s27 = int_to_ptr.vmem [resolvable:$true] %s28_s27 }
  0x15   :  { %p228_p9 = scmp.lt.u32.totalorder %s224_s30, %s341_s1 }
  0x17   :  { %p230_p10 = pnand %p228_p9, %p225_p8 }
  0x19   :  { %233 = shalt.err (!%p230_p10)
}
  0x1a   :  { %s234_s8 = scalar_lea.vmem %s29_s27, 384  ;;  %p239_p12 = scmp.lt.s32.totalorder %s29_s27, %s29_s27 }
  0x1b   :  { %p235_p11 = scmp.ne.s32.totalorder %s29_s27, %s234_s8  ;;  %p240_p13 = scmp.lt.s32.totalorder %s234_s8, %s234_s8 }
  0x1d   :  { %p241_p0 = por %p240_p13, %p239_p12 }
  0x1f   :  { %p242_p1 = pnand %p241_p0, %p235_p11 }
  0x21   :  { %245 = shalt.err (!%p242_p1)
}
  0x22   :  { %34 = dma.hbm_to_vmem [thread:$0]  %s341_s1, 384, %s29_s27, [#allocation6], %s275_s22, %s275_s22, %s276_s23  }
  0x23   :  { %268 = dma.done.wait [#allocation3], 256  }
  0x24   :  { %269 = vsyncadd [#allocation3], 4294967040 }
  0x25   :  { %270 = dma.done.wait [#allocation6], 384  }
  0x26   :  { %271 = vsyncadd [#allocation6], 4294966912  ;;  %v197_v0 = vld [vmem:[#allocation5] sm:$0xff]   ;;  %v198_v1 = vld [vmem:[#allocation5 + $0x8] sm:$0xff]   ;;  %vm89_vm0 = vcmask 392192   ;;  %s278_s11 = smov [#allocation7]  }
  0x27   :  { %180 = vmatprep.subr.bf16.mxu0 %v197_v0  ;;  %v200_v2 = vld [vmem:[#allocation2] sm:$0xff]   ;;  %v201_v4 = vld [vmem:[#allocation2 + $0x8] sm:$0xff]   ;;  %s154_s12 = sshll.u32 %s278_s11, 4  ;;  %s155_s12 = int_to_ptr.vmem [resolvable:$true] %s154_s12 }
  0x28   :  { %181 = vmatpush3.bf16.msra.mxu0 %v197_v0  ;;  %v199_v3 = vld [vmem:[#allocation5 + $0x10] sm:$0xff]   ;;  %186 = vmatprep.mubr.msk.bf16.mxu0 %vm89_vm0, %v200_v2  ;;  %s246_s13 = scalar_lea.vmem %s155_s12, 512  ;;  %p251_p3 = scmp.lt.s32.totalorder %s155_s12, %s155_s12 }
  0x29   :  { %182 = vmatprep.subr.bf16.mxu0 %v198_v1  ;;  %v167_v5 = vld [vmem:[%s342_s2] ss:$0 sm:$0xff]  ;;  %p247_p2 = scmp.ne.s32.totalorder %s155_s12, %s246_s13  ;;  %p252_p4 = scmp.lt.s32.totalorder %s246_s13, %s246_s13 }
  0x2b   :  { %p253_p5 = por %p252_p4, %p251_p3 }
  0x2c   :  { %183 = vmatpush3.bf16.msra.mxu0 %v198_v1 }
  0x2d   :  { %184 = vmatprep.subr.bf16.mxu0 %v199_v3  ;;  %p254_p6 = pnand %p253_p5, %p247_p2 }
  0x30   :  { %185 = vmatpush3.bf16.msra.mxu0 %v199_v3 }
  0x33   :  { %187 = vmatmul.mubr.msk.bf16.vlgmr.msra.gmra.mrb[0].mxu0 %vm89_vm0, %v201_v4 }
 0x106   :  { %v188_v6 = vpop.f32.mrb[0].mxu0 }
 0x107   :  { %v139_v7 = vadd.f32 %v188_v6, %v167_v5  ;;  %v130_v8 = vpop.f32.mrb[1].mxu0 }
 0x108   :  { %v131_v9 = vadd.f32 %v167_v5, %v130_v8  ;;  %v189_v10 = vpop.f32.mrb[2].mxu0 }
 0x109   :  { %147 = vst [vmem:[#allocation7 + $0x10] sm:$0xff] %v139_v7  ;;  %v142_v11 = vadd.f32 %v189_v10, %v167_v5  ;;  %v133_v12 = vpop.f32.mrb[3].mxu0 }
 0x10a   :  { %145 = vst [vmem:[#allocation7] sm:$0xff] %v131_v9  ;;  %v134_v13 = vadd.f32 %v167_v5, %v133_v12 }
 0x10b   :  { %148 = vst [vmem:[#allocation7 + $0x18] sm:$0xff] %v142_v11 }
 0x10c   :  { %146 = vst [vmem:[#allocation7 + $0x8] sm:$0xff] %v134_v13 }
 0x10d   :  { %257 = shalt.err (!%p254_p6)
}
 0x10e   :  { %s258_s15 = scalar_lea.hbm %s343_s3, 512 }
 0x10f   :  { %p259_p7 = scmp.ne.s32.totalorder %s343_s3, %s258_s15  ;;  %p262_p8 = scmp.lt.u32.totalorder %s258_s15, %s343_s3 }
 0x111   :  { %p264_p9 = pnand %p262_p8, %p259_p7 }
 0x113   :  { %267 = shalt.err (!%p264_p9)
}
 0x114   :  { %s279_s20 = smov 128   ;;  %s280_s21 = smov 8  }
 0x115   :  { %160 = dma.vmem_to_hbm [thread:$0]  %s155_s12, 512, %s343_s3, [#allocation4], %s279_s20, %s279_s20, %s280_s21  }
 0x116   :  { %272 = dma.done.wait [#allocation4], 512  }
 0x117   :  { %273 = vsyncadd [#allocation4], 4294966784 }
 0x118   :  { %164 = vsyncpa [#allocation3], 1 }
 0x119   :  { %165 = vsyncpa [#allocation6], 1 }
 0x11a   :  { %166 = vsyncpa [#allocation4], 1 }

</bundles_post_ra>
